<compile_context>
chip_gen: v7x
topology: tpu7x:2x2x1
jax: 0.10.0
libtpu: 0.0.40
codegen_flags: <defaults>
</compile_context>

<pallas_src>
import jax
import jax.numpy as jnp
import numpy as np
from jax import lax
from jax.experimental import pallas as pl
from jax.experimental.pallas import tpu as pltpu


def single_hop_kernel(q_ref, kb_ref, nobj_ref, wq_ref, bq_ref, wa_ref, ba_ref, out_ref):
    # proj_q = vecQuestions @ Wq^T + bq                       -> (TB, D)  (MXU)
    proj_q = jnp.dot(q_ref[...], wq_ref[...],
                     preferred_element_type=jnp.float32) + bq_ref[...]

    # interactions = F.normalize(kb * proj_q[:, None, :], dim=-1)
    kb = kb_ref[...]                                          # (TB, N, D)
    inter = kb * proj_q[:, None, :]                           # broadcast over N
    ss = jnp.sum(inter * inter, axis=-1, keepdims=True)       # (TB, N, 1)
    # rsqrt on the EUP; clamping the squared sum at eps^2 reproduces
    # F.normalize's  x / max(||x||, 1e-12)  exactly (including all-zero rows).
    inter = inter * lax.rsqrt(jnp.maximum(ss, jnp.float32(1e-24)))

    # raw_att = inter2att(interactions).squeeze(-1)           -> (TB, N), lane-major
    raw = jnp.sum(inter * wa_ref[...], axis=-1) + ba_ref[0, 0]

    # apply_mask1d: positions >= imagesObjectNum get -1e30
    n_valid = nobj_ref[...]                                   # (TB, 1) int32
    idx = lax.broadcasted_iota(jnp.int32, raw.shape, 1)       # (TB, N)
    raw = jnp.where(idx >= n_valid, jnp.float32(-1e30), raw)

    # softmax over objects (lane axis)
    m = jnp.max(raw, axis=-1, keepdims=True)                  # (TB, 1)
    e = jnp.exp(raw - m)
    denom = jnp.sum(e, axis=-1, keepdims=True)
    att = e * pl.reciprocal(denom)                            # (TB, N)

    # x_att = bmm(att[:, None, :], kb)                        -> (TB, 1, D)  (MXU)
    x = jnp.einsum('bqn,bnd->bqd', att[:, None, :], kb,
                   preferred_element_type=jnp.float32)
    out_ref[...] = x


def single_hop(kb, vecQuestions, imagesObjectNum, wq, bq, wa, ba, *, block_b=None):
    B, N, D = kb.shape
    E = vecQuestions.shape[-1]

    # Batch tile: whole batch if tiny, otherwise a multiple of 8 (sublane rule).
    if block_b is None:
        block_b = B if B <= 8 else 64

    # Pad batch to a multiple of block_b; padded rows are masked (nobj=0) and
    # sliced off below.
    Bp = pl.cdiv(B, block_b) * block_b
    if Bp != B:
        pad = Bp - B
        kb = jnp.pad(kb, ((0, pad), (0, 0), (0, 0)))
        vecQuestions = jnp.pad(vecQuestions, ((0, pad), (0, 0)))
        imagesObjectNum = jnp.pad(imagesObjectNum, ((0, pad),))
    nobj = imagesObjectNum.astype(jnp.int32).reshape(Bp, 1)

    out = pl.pallas_call(
        single_hop_kernel,
        out_shape=jax.ShapeDtypeStruct((Bp, 1, D), jnp.float32),
        grid_spec=pltpu.PrefetchScalarGridSpec(
            num_scalar_prefetch=0,
            grid=(Bp // block_b,),
            in_specs=[
                pl.BlockSpec((block_b, E), lambda i: (i, 0)),         # vecQuestions
                pl.BlockSpec((block_b, N, D), lambda i: (i, 0, 0)),   # kb
                pl.BlockSpec((block_b, 1), lambda i: (i, 0)),         # imagesObjectNum
                pl.BlockSpec((E, D), lambda i: (0, 0)),               # wq (= proj_q.weight.T)
                pl.BlockSpec((1, D), lambda i: (0, 0)),               # bq
                pl.BlockSpec((1, D), lambda i: (0, 0)),               # wa (= inter2att.weight)
                pl.BlockSpec((1, 1), lambda i: (0, 0)),               # ba
            ],
            out_specs=pl.BlockSpec((block_b, 1, D), lambda i: (i, 0, 0)),
        ),
        compiler_params=pltpu.CompilerParams(
            # Batch tiles are fully independent -> shardable across v7x's 2 TCs.
            dimension_semantics=("parallel",),
        ),
    )(vecQuestions, kb, nobj, wq, bq, wa, ba)

    return out.reshape(Bp, D)[:B]


def single_hop_ref(kb, vecQuestions, imagesObjectNum, wq, bq, wa, ba):
    """Pure-JAX reference mirroring the PyTorch forward."""
    proj_q = vecQuestions @ wq + bq                               # (B, D)
    inter = kb * proj_q[:, None, :]
    norm = jnp.sqrt(jnp.sum(inter * inter, axis=-1, keepdims=True))
    inter = inter / jnp.maximum(norm, 1e-12)
    raw = jnp.sum(inter * wa[None, :, :], axis=-1) + ba[0, 0]     # (B, N)
    N = kb.shape[1]
    mask = jnp.arange(N)[None, :] >= imagesObjectNum[:, None]
    raw = jnp.where(mask, -1e30, raw)
    att = jax.nn.softmax(raw, axis=-1)
    return jnp.einsum('bn,bnd->bd', att, kb)


if __name__ == "__main__":
    B, N, ENC_DIM, CTX_DIM = 4, 16, 32, 128

    key = jax.random.PRNGKey(0)
    k_kb, k_q, k_wq, k_bq, k_wa, k_ba = jax.random.split(key, 6)

    kb = jax.random.normal(k_kb, (B, N, CTX_DIM), dtype=jnp.float32)
    vecQuestions = jax.random.normal(k_q, (B, ENC_DIM), dtype=jnp.float32)
    imagesObjectNum = jnp.array([11, 16, 3, 7], dtype=jnp.int32)

    # nn.Linear shapes: proj_q W [CTX, ENC], b [CTX]; inter2att W [1, CTX], b [1].
    # Stored pre-transposed / pre-reshaped for the kernel.
    wq = 0.1 * jax.random.normal(k_wq, (ENC_DIM, CTX_DIM), dtype=jnp.float32)   # W_proj_q.T
    bq = 0.1 * jax.random.normal(k_bq, (1, CTX_DIM), dtype=jnp.float32)
    wa = 0.1 * jax.random.normal(k_wa, (1, CTX_DIM), dtype=jnp.float32)         # W_inter2att
    ba = 0.1 * jax.random.normal(k_ba, (1, 1), dtype=jnp.float32)

    out = single_hop(kb, vecQuestions, imagesObjectNum, wq, bq, wa, ba)
    out = jax.block_until_ready(out)

    ref = single_hop_ref(kb, vecQuestions, imagesObjectNum, wq, bq, wa, ba)
    np.testing.assert_allclose(np.asarray(out), np.asarray(ref), rtol=1e-4, atol=1e-5)

    print("KERNEL_OK")
</pallas_src>

<mosaic_0001>
module attributes {stable_mosaic.version = 11 : i64} {
  func.func @single_hop_kernel(%arg0: i32, %arg1: memref<4x32xf32, #tpu.memory_space<vmem>>, %arg2: memref<4x16x128xf32, #tpu.memory_space<vmem>>, %arg3: memref<4x1xi32, #tpu.memory_space<vmem>>, %arg4: memref<32x128xf32, #tpu.memory_space<vmem>>, %arg5: memref<1x128xf32, #tpu.memory_space<vmem>>, %arg6: memref<1x128xf32, #tpu.memory_space<vmem>>, %arg7: memref<1x1xf32, #tpu.memory_space<vmem>>, %arg8: memref<4x1x128xf32, #tpu.memory_space<vmem>>) attributes {dimension_semantics = [#tpu.dimension_semantics<parallel>], iteration_bounds = array<i64: 1>, scalar_prefetch = 0 : i64, scratch_operands = 0 : i64, tpu.core_type = #tpu.core_type<tc>, window_params = [{transform_indices = @transform_0, window_bounds = array<i64: 4, 32>}, {transform_indices = @transform_1, window_bounds = array<i64: 4, 16, 128>}, {transform_indices = @transform_2, window_bounds = array<i64: 4, 1>}, {pipeline_mode = #tpu.pipeline_mode<synchronous>, transform_indices = @transform_3, window_bounds = array<i64: 32, 128>}, {pipeline_mode = #tpu.pipeline_mode<synchronous>, transform_indices = @transform_4, window_bounds = array<i64: 1, 128>}, {pipeline_mode = #tpu.pipeline_mode<synchronous>, transform_indices = @transform_5, window_bounds = array<i64: 1, 128>}, {pipeline_mode = #tpu.pipeline_mode<synchronous>, transform_indices = @transform_6, window_bounds = array<i64: 1, 1>}, {transform_indices = @transform_7, window_bounds = array<i64: 4, 1, 128>}]} {
    %c0 = arith.constant 0 : index
    %c0_0 = arith.constant 0 : index
    %0 = vector.load %arg1[%c0, %c0_0] : memref<4x32xf32, #tpu.memory_space<vmem>>, vector<4x32xf32>
    %c0_1 = arith.constant 0 : index
    %c0_2 = arith.constant 0 : index
    %1 = vector.load %arg4[%c0_1, %c0_2] : memref<32x128xf32, #tpu.memory_space<vmem>>, vector<32x128xf32>
    %cst = arith.constant dense<0.000000e+00> : vector<4x128xf32>
    %2 = tpu.matmul %0, %1, %cst {dimension_numbers = #tpu.dot_dimension_numbers<[1], [0], [0], [1], [0, 0, 1, 1], [], []>} : vector<4x32xf32>, vector<32x128xf32>, vector<4x128xf32> -> vector<4x128xf32>
    %c0_3 = arith.constant 0 : index
    %c0_4 = arith.constant 0 : index
    %3 = vector.load %arg5[%c0_3, %c0_4] : memref<1x128xf32, #tpu.memory_space<vmem>>, vector<1x128xf32>
    %4 = vector.broadcast %3 : vector<1x128xf32> to vector<4x128xf32>
    %5 = arith.addf %2, %4 : vector<4x128xf32>
    %c0_5 = arith.constant 0 : index
    %c0_6 = arith.constant 0 : index
    %c0_7 = arith.constant 0 : index
    %6 = vector.load %arg2[%c0_5, %c0_6, %c0_7] : memref<4x16x128xf32, #tpu.memory_space<vmem>>, vector<4x16x128xf32>
    %7 = vector.shape_cast %5 : vector<4x128xf32> to vector<4x1x128xf32>
    %8 = vector.broadcast %7 : vector<4x1x128xf32> to vector<4x16x128xf32>
    %9 = arith.mulf %6, %8 : vector<4x16x128xf32>
    %10 = arith.mulf %9, %9 : vector<4x16x128xf32>
    %cst_8 = arith.constant dense<0.000000e+00> : vector<4x16xf32>
    %11 = vector.multi_reduction <add>, %10, %cst_8 [2] : vector<4x16x128xf32> to vector<4x16xf32>
    %12 = vector.shape_cast %11 : vector<4x16xf32> to vector<4x16x1xf32>
    %cst_9 = arith.constant 1.000000e-24 : f32
    %13 = vector.broadcast %cst_9 : f32 to vector<4x16x1xf32>
    %14 = arith.maximumf %12, %13 : vector<4x16x1xf32>
    %15 = math.rsqrt %14 : vector<4x16x1xf32>
    %16 = vector.broadcast %15 : vector<4x16x1xf32> to vector<4x16x128xf32>
    %17 = arith.mulf %9, %16 : vector<4x16x128xf32>
    %c0_10 = arith.constant 0 : index
    %c0_11 = arith.constant 0 : index
    %18 = vector.load %arg6[%c0_10, %c0_11] : memref<1x128xf32, #tpu.memory_space<vmem>>, vector<1x128xf32>
    %19 = vector.shape_cast %18 : vector<1x128xf32> to vector<1x1x128xf32>
    %20 = vector.broadcast %19 : vector<1x1x128xf32> to vector<4x16x128xf32>
    %21 = arith.mulf %17, %20 : vector<4x16x128xf32>
    %cst_12 = arith.constant dense<0.000000e+00> : vector<4x16xf32>
    %22 = vector.multi_reduction <add>, %21, %cst_12 [2] : vector<4x16x128xf32> to vector<4x16xf32>
    %c0_13 = arith.constant 0 : index
    %c0_14 = arith.constant 0 : index
    %23 = vector.load %arg7[%c0_13, %c0_14] : memref<1x1xf32, #tpu.memory_space<vmem>>, vector<1x1xf32>
    %24 = vector.extract %23[0, 0] : f32 from vector<1x1xf32>
    %25 = vector.broadcast %24 : f32 to vector<4x16xf32>
    %26 = arith.addf %22, %25 : vector<4x16xf32>
    %c0_15 = arith.constant 0 : index
    %c0_16 = arith.constant 0 : index
    %27 = vector.load %arg3[%c0_15, %c0_16] : memref<4x1xi32, #tpu.memory_space<vmem>>, vector<4x1xi32>
    %28 = tpu.iota {dimensions = array<i32: 1>} : vector<4x16xi32>
    %29 = vector.broadcast %27 : vector<4x1xi32> to vector<4x16xi32>
    %30 = arith.cmpi sge, %28, %29 : vector<4x16xi32>
    %cst_17 = arith.constant -1.000000e+30 : f32
    %31 = vector.broadcast %cst_17 : f32 to vector<4x16xf32>
    %32 = arith.select %30, %31, %26 : vector<4x16xi1>, vector<4x16xf32>
    %cst_18 = arith.constant dense<0xFF800000> : vector<4xf32>
    %33 = vector.multi_reduction <maximumf>, %32, %cst_18 [1] : vector<4x16xf32> to vector<4xf32>
    %34 = vector.shape_cast %33 : vector<4xf32> to vector<4x1xf32>
    %35 = vector.broadcast %34 : vector<4x1xf32> to vector<4x16xf32>
    %36 = arith.subf %32, %35 : vector<4x16xf32>
    %37 = math.exp %36 : vector<4x16xf32>
    %cst_19 = arith.constant dense<0.000000e+00> : vector<4xf32>
    %38 = vector.multi_reduction <add>, %37, %cst_19 [1] : vector<4x16xf32> to vector<4xf32>
    %39 = vector.shape_cast %38 : vector<4xf32> to vector<4x1xf32>
    %40 = tpu.reciprocal %39 : vector<4x1xf32> -> vector<4x1xf32>
    %41 = vector.broadcast %40 : vector<4x1xf32> to vector<4x16xf32>
    %42 = arith.mulf %37, %41 : vector<4x16xf32>
    %43 = vector.shape_cast %42 : vector<4x16xf32> to vector<4x1x16xf32>
    "tpu.trace_start"() <{level = 10 : i32, message = "bqn,bnd->bqd"}> : () -> ()
    %cst_20 = arith.constant dense<0.000000e+00> : vector<4x1x128xf32>
    %44 = tpu.matmul %43, %6, %cst_20 {dimension_numbers = #tpu.dot_dimension_numbers<[2], [1], [1], [2], [0, 0, 0, 1, 1, 2], [0], [0]>} : vector<4x1x16xf32>, vector<4x16x128xf32>, vector<4x1x128xf32> -> vector<4x1x128xf32>
    "tpu.trace_stop"() : () -> ()
    %c0_21 = arith.constant 0 : index
    %c0_22 = arith.constant 0 : index
    %c0_23 = arith.constant 0 : index
    %45 = vector.load %arg8[%c0_21, %c0_22, %c0_23] : memref<4x1x128xf32, #tpu.memory_space<vmem>>, vector<4x1x128xf32>
    tpu.vector_store %arg8[%c0_21, %c0_22, %c0_23], %44 {strides = array<i32>} : memref<4x1x128xf32, #tpu.memory_space<vmem>>, vector<4x1x128xf32>,
    return
  }
  func.func @transform_0(%arg0: i32) -> (i32, i32) {
    %c0_i32 = arith.constant 0 : i32
    %c0_i32_0 = arith.constant 0 : i32
    return %arg0, %c0_i32 : i32, i32
  }
  func.func @transform_1(%arg0: i32) -> (i32, i32, i32) {
    %c0_i32 = arith.constant 0 : i32
    %c0_i32_0 = arith.constant 0 : i32
    %c0_i32_1 = arith.constant 0 : i32
    return %arg0, %c0_i32, %c0_i32_0 : i32, i32, i32
  }
  func.func @transform_2(%arg0: i32) -> (i32, i32) {
    %c0_i32 = arith.constant 0 : i32
    %c0_i32_0 = arith.constant 0 : i32
    return %arg0, %c0_i32 : i32, i32
  }
  func.func @transform_3(%arg0: i32) -> (i32, i32) {
    %c0_i32 = arith.constant 0 : i32
    %c0_i32_0 = arith.constant 0 : i32
    %c0_i32_1 = arith.constant 0 : i32
    return %c0_i32, %c0_i32_0 : i32, i32
  }
  func.func @transform_4(%arg0: i32) -> (i32, i32) {
    %c0_i32 = arith.constant 0 : i32
    %c0_i32_0 = arith.constant 0 : i32
    %c0_i32_1 = arith.constant 0 : i32
    return %c0_i32, %c0_i32_0 : i32, i32
  }
  func.func @transform_5(%arg0: i32) -> (i32, i32) {
    %c0_i32 = arith.constant 0 : i32
    %c0_i32_0 = arith.constant 0 : i32
    %c0_i32_1 = arith.constant 0 : i32
    return %c0_i32, %c0_i32_0 : i32, i32
  }
  func.func @transform_6(%arg0: i32) -> (i32, i32) {
    %c0_i32 = arith.constant 0 : i32
    %c0_i32_0 = arith.constant 0 : i32
    %c0_i32_1 = arith.constant 0 : i32
    return %c0_i32, %c0_i32_0 : i32, i32
  }
  func.func @transform_7(%arg0: i32) -> (i32, i32, i32) {
    %c0_i32 = arith.constant 0 : i32
    %c0_i32_0 = arith.constant 0 : i32
    %c0_i32_1 = arith.constant 0 : i32
    return %arg0, %c0_i32, %c0_i32_0 : i32, i32, i32
  }
}

</mosaic_0001>

<bundles_post_ra>
// kernel: tpu_custom_call.1
= control target key start
LH: loop header
LB: loop body
LE: loop exit
PB: predicated region body
PF: predicated region fallthrough
CT: control target
= control target key end

     0   :  { %s1059_s0 = inlined_call_operand.vmem [shape: f32[4,32], index: 0, kind: input, shape index: {}]   ;;  %s1060_s1 = inlined_call_operand.hbm [shape: f32[4,16,128], index: 1, kind: input, shape index: {}]   ;;  %s1061_s2 = inlined_call_operand.vmem [shape: s32[4,1], index: 2, kind: input, shape index: {}]   ;;  %s1062_s3 = inlined_call_operand.hbm [shape: f32[32,128], index: 3, kind: input, shape index: {}]   ;;  %s1063_s4 = inlined_call_operand.vmem [shape: f32[1,128], index: 4, kind: input, shape index: {}]   ;;  %s1064_s5 = inlined_call_operand.vmem [shape: f32[1,128], index: 5, kind: input, shape index: {}]   ;;  %s1065_s6 = inlined_call_operand.<no memory space> [shape: f32[1,1], index: 6, kind: input, shape index: {}]   ;;  %s1066_s7 = inlined_call_operand.hbm [shape: f32[4,1,128], index: 7, kind: output, shape index: {}]  }
   0x1   :  { %v12_v0 = vstv %s1065_s6 }
   0x2   :  { %13 = vst [vmem:[#allocation2] sm:$0x1] %v12_v0 }
   0x3   :  { %14 = vsyncpa [#allocation4], 0 }
   0x4   :  { %15 = vsyncpa [#allocation7], 0 }
   0x5   :  { %16 = vsyncpa [#allocation5], 0  ;;  %s891_s26 = smov [#allocation3]   ;;  %s819_s30 = scalar_lea.hbm %s1060_s1, 1024 }
   0x6   :  { %s24_s27 = sshll.u32 %s891_s26, 4  ;;  %p820_p0 = scmp.ne.s32.totalorder %s1060_s1, %s819_s30  ;;  %s25_s27 = int_to_ptr.vmem [resolvable:$true] %s24_s27 }
   0x7   :  { %p823_p1 = scmp.lt.u32.totalorder %s819_s30, %s1060_s1 }
   0x9   :  { %p825_p2 = pnand %p823_p1, %p820_p0 }
   0xb   :  { %828 = shalt.err (!%p825_p2)
}
   0xc   :  { %s829_s6 = scalar_lea.vmem %s25_s27, 1024  ;;  %p834_p4 = scmp.lt.s32.totalorder %s25_s27, %s25_s27 }
   0xd   :  { %p830_p3 = scmp.ne.s32.totalorder %s25_s27, %s829_s6  ;;  %p835_p5 = scmp.lt.s32.totalorder %s829_s6, %s829_s6 }
   0xf   :  { %p836_p6 = por %p835_p5, %p834_p4 }
  0x11   :  { %p837_p7 = pnand %p836_p6, %p830_p3 }
  0x13   :  { %840 = shalt.err (!%p837_p7)
}
  0x14   :  { %s892_s12 = smov 128   ;;  %s893_s13 = smov 8  }
  0x15   :  { %30 = dma.hbm_to_vmem [thread:$0]  %s1060_s1, 1024, %s25_s27, [#allocation4], %s892_s12, %s892_s12, %s893_s13  }
  0x16   :  { %s894_s16 = smov [#allocation6]   ;;  %s841_s20 = scalar_lea.hbm %s1062_s3, 512 }
  0x17   :  { %s38_s17 = sshll.u32 %s894_s16, 4  ;;  %p842_p8 = scmp.ne.s32.totalorder %s1062_s3, %s841_s20  ;;  %s39_s17 = int_to_ptr.vmem [resolvable:$true] %s38_s17 }
  0x18   :  { %p845_p9 = scmp.lt.u32.totalorder %s841_s20, %s1062_s3 }
  0x1a   :  { %p847_p10 = pnand %p845_p9, %p842_p8 }
  0x1c   :  { %850 = shalt.err (!%p847_p10)
}
  0x1d   :  { %s851_s25 = scalar_lea.vmem %s39_s17, 512  ;;  %p856_p12 = scmp.lt.s32.totalorder %s39_s17, %s39_s17 }
  0x1e   :  { %p852_p11 = scmp.ne.s32.totalorder %s39_s17, %s851_s25  ;;  %p857_p13 = scmp.lt.s32.totalorder %s851_s25, %s851_s25 }
  0x20   :  { %p858_p0 = por %p857_p13, %p856_p12 }
  0x22   :  { %p859_p1 = pnand %p858_p0, %p852_p11 }
  0x24   :  { %862 = shalt.err (!%p859_p1)
}
  0x25   :  { %44 = dma.hbm_to_vmem [thread:$0]  %s1062_s3, 512, %s39_s17, [#allocation7], %s892_s12, %s892_s12, %s893_s13  }
  0x26   :  { %885 = dma.done.wait [#allocation4], 1024  }
  0x27   :  { %886 = vsyncadd [#allocation4], 4294966272 }
  0x28   :  { %887 = dma.done.wait [#allocation7], 512  }
  0x29   :  { %888 = vsyncadd [#allocation7], 4294966784  ;;  %v895_v1 = vmov 0.0|0.0   ;;  %vm896_vm0 = vmmov 0   ;;  %v897_v2 = vmov 0.0   ;;  %v58_v3 = vld [vmem:[#allocation6] sm:$0xff]  ;;  %v155_v15 = vlaneseq }
  0x2a   :  { %766 = vmatprep.subr.bf16.mxu0 %v895_v1  ;;  %735 = vmatprep.mubr.msk.f32.mxu0 %vm896_vm0, %v897_v2  ;;  %v59_v4 = vld [vmem:[#allocation6 + $0x8] sm:$0xff]  ;;  %v60_v5 = vld [vmem:[#allocation6 + $0x10] sm:$0xff]  ;;  %v61_v7 = vld [vmem:[#allocation6 + $0x18] sm:$0xff]  ;;  %vm69_vm1 = vcmask 261120   ;;  %v898_v13 = vmov 1966171168  }
  0x2b   :  { %772 = vmatprep.subr.bf16.mxu1 %v895_v1  ;;  %742 = vmatprep.mubr.msk.f32.mxu1 %vm896_vm0, %v897_v2  ;;  %v767_v6 = vpack.c.bf16 %v59_v4, %v58_v3  ;;  %v770_v8 = vpack.c.bf16 %v61_v7, %v60_v5  ;;  %v57_v9 = vld [vmem:[%s1059_s0] sm:$0xf]  ;;  %v148_v11 = vld [vmem:[#allocation3 + $0x28] sm:$0xff]  ;;  %v153_v14 = vunpack.c.l.s4 %v898_v13  ;;  %v984_v17 = vshrl.u32 %v155_v15, 7  ;;  %v1000_v32 = vld [vmem:[#allocation3 + $0x10] sm:$0xff] }
  0x2c   :  { %v147_v10 = vld [vmem:[#allocation3 + $0x20] sm:$0xff]  ;;  %v703_v18 = vld [vmem:[%s1063_s4] ss:$0 sm:$0xff]  ;;  %v998_v31 = vld [vmem:[#allocation3 + $0x8] sm:$0xff]  ;;  %v899_v56 = vmov 0   ;;  %vm318_vm2 = vcmask 130112  }
  0x2d   :  { %768 = vmatpush3.bf16.msra.mxu0 %v767_v6  ;;  %v779_v12 = vpack.c.bf16 %v148_v11, %v147_v10  ;;  %v154_v16 = vunpack.c.0.s8 %v153_v14  ;;  %v178_v24 = vsub.s32 0, %v984_v17  ;;  %v995_v27 = vld [vmem:[#allocation3] sm:$0xff]  ;;  %v1003_v35 = vld [vmem:[#allocation3 + $0x18] sm:$0xff]  ;;  %v1012_v46 = vld [vmem:[#allocation3 + $0x30] sm:$0xff]  ;;  %798 = vset.pattern.permute.xlu0 %v899_v56  ;;  %vm347_vm3 = vcmask 1041409  }
  0x2e   :  { %769 = vmatprep.subr.bf16.mxu0 %v895_v1  ;;  %v1014_v49 = vld [vmem:[#allocation3 + $0x38] sm:$0xff]  ;;  %vm349_vm4 = vcmask 1042434   ;;  %vm351_vm5 = vcmask 1043459   ;;  %vm355_vm7 = vcmask 125952   ;;  %vm392_vm8 = vcmask 130048  }
  0x2f   :  { %v990_v19 = vsub.s32 %v154_v16, %v984_v17  ;;  %v283_v57 = vld [vmem:[#allocation2] sm:$0x1] }
  0x30   :  { %784 = vpush %v283_v57 }
  0x31   :  { %771 = vmatpush3.bf16.msra.mxu0 %v770_v8 }
  0x32   :  { %778 = vmatprep.subr.bf16.mxu0 %v895_v1 }
  0x34   :  { %736 = vmatmul.mubr.msk.f32.vlgmr.msra.gmra.mrb[0].mxu0 %vm69_vm1, %v57_v9 }
  0x35   :  { %756 = vmatprep.mubr.msk.f32.mxu0 %vm896_vm0, %v897_v2  ;;  %780 = vmatpush3.bf16.msra.mxu0 %v779_v12 }
  0x61   :  { %s785_s8 = spop %784 }
 0x107   :  { %v139_v20 = vpop.f32.mrb[0].mxu0 }
 0x108   :  { %v140_v21 = vadd.f32 %v703_v18, %v139_v20  ;;  %v737_v22 = vpop.f32.mrb[1].mxu0 }
 0x10a   :  { %v158_v23 = vrot.slane %v140_v21, %v990_v19 }
 0x10c   :  { %v159_v25 = vcombine.high %v158_v23, %v158_v23  ;;  %v166_v26 = vrot.slane %v158_v23, %v990_v19 }
 0x10e   :  { %v174_v28 = vcombine.high %v166_v26, %v166_v26  ;;  %v179_v29 = vrot.slane %v166_v26, %v178_v24  ;;  %v173_v30 = vrot.slane %v159_v25, %v990_v19 }
 0x110   :  { %v196_v33 = vmul.f32 %v179_v29, %v995_v27  ;;  %v183_v34 = vrot.slane %v173_v30, %v178_v24  ;;  %v1006_v36 = vmul.f32 %v179_v29, %v998_v31  ;;  %v187_v39 = vrot.slane %v174_v28, %v178_v24 }
 0x111   :  { %v175_v40 = vcombine.high %v173_v30, %v173_v30 }
 0x112   :  { %v204_v37 = vmul.f32 %v196_v33, %v196_v33  ;;  %v198_v38 = vmul.f32 %v183_v34, %v1000_v32  ;;  %v199_v42 = vmul.f32 %v183_v34, %v1003_v35  ;;  %v205_v43 = vmul.f32 %v1006_v36, %v1006_v36 }
 0x113   :  { %v200_v44 = vmul.f32 %v187_v39, %v147_v10  ;;  %v191_v45 = vrot.slane %v175_v40, %v178_v24  ;;  %v201_v48 = vmul.f32 %v187_v39, %v148_v11  ;;  %v705_v11 = vld [vmem:[%s1064_s5] ss:$0 sm:$0xff] }
 0x114   :  { %212 = vadd.xlane.f32.xlu0 %v204_v37  ;;  %v206_v41 = vmul.f32 %v198_v38, %v198_v38  ;;  %v207_v47 = vmul.f32 %v199_v42, %v199_v42 }
 0x115   :  { %v208_v50 = vmul.f32 %v200_v44, %v200_v44  ;;  %v202_v51 = vmul.f32 %v191_v45, %v1012_v46  ;;  %v209_v52 = vmul.f32 %v201_v48, %v201_v48  ;;  %v203_v53 = vmul.f32 %v191_v45, %v1014_v49 }
 0x116   :  { %216 = vadd.xlane.f32.xlu1 %v206_v41 }
 0x117   :  { %v210_v54 = vmul.f32 %v202_v51, %v202_v51  ;;  %v211_v55 = vmul.f32 %v203_v53, %v203_v53 }
 0x118   :  { %214 = vadd.xlane.f32.xlu0 %v205_v43 }
 0x11a   :  { %218 = vadd.xlane.f32.xlu1 %v207_v47 }
 0x11c   :  { %220 = vadd.xlane.f32.xlu0 %v208_v50  ;;  %v296_v50 = vand.u32 127, %v155_v15 }
 0x11e   :  { %222 = vadd.xlane.f32.xlu1 %v209_v52  ;;  %v285_v52 = vstv %s785_s8 }
 0x120   :  { %224 = vadd.xlane.f32.xlu0 %v210_v54 }
 0x122   :  { %226 = vadd.xlane.f32.xlu1 %v211_v55 }
 0x1a1   :  { %v213_v58 = vpop.xlane.xlu0 %212 }
 0x1a2   :  { %v228_v59 = vmax.f32 %v213_v58, 1e-24 }
 0x1a3   :  { %v217_v60 = vpop.xlane.xlu1 %216 }
 0x1a4   :  { %799 = vrsqrt.f32 %v228_v59  ;;  %v230_v61 = vmax.f32 %v217_v60, 1e-24 }
 0x1a5   :  { %v215_v62 = vpop.xlane.xlu0 %214 }
 0x1a6   :  { %801 = vrsqrt.f32 %v230_v61  ;;  %v229_v63 = vmax.f32 %v215_v62, 1e-24  ;;  %v311_v62 = vsub.s32 %v296_v50, %v984_v17 }
 0x1a7   :  { %v219_v0 = vpop.xlane.xlu1 %218 }
 0x1a8   :  { %803 = vrsqrt.f32 %v229_v63  ;;  %v231_v3 = vmax.f32 %v219_v0, 1e-24 }
 0x1a9   :  { %v221_v4 = vpop.xlane.xlu0 %220 }
 0x1aa   :  { %805 = vrsqrt.f32 %v231_v3  ;;  %v232_v5 = vmax.f32 %v221_v4, 1e-24 }
 0x1ab   :  { %v223_v6 = vpop.xlane.xlu1 %222 }
 0x1ac   :  { %807 = vrsqrt.f32 %v232_v5  ;;  %v233_v7 = vmax.f32 %v223_v6, 1e-24 }
 0x1ad   :  { %v225_v8 = vpop.xlane.xlu0 %224 }
 0x1ae   :  { %v800_v9 = vpop.eup %799  ;;  %809 = vrsqrt.f32 %v233_v7  ;;  %v234_v10 = vmax.f32 %v225_v8, 1e-24 }
 0x1af   :  { %v227_v12 = vpop.xlane.xlu1 %226  ;;  %v244_v13 = vmul.f32 %v800_v9, %v196_v33 }
 0x1b0   :  { %v802_v14 = vpop.eup %801  ;;  %811 = vrsqrt.f32 %v234_v10  ;;  %v235_v16 = vmax.f32 %v227_v12, 1e-24 }
 0x1b1   :  { %v259_v18 = vmul.f32 %v705_v11, %v244_v13  ;;  %v246_v20 = vmul.f32 %v802_v14, %v198_v38 }
 0x1b2   :  { %v804_v21 = vpop.eup %803  ;;  %813 = vrsqrt.f32 %v235_v16 }
 0x1b3   :  { %267 = vadd.xlane.f32.xlu0 %v259_v18  ;;  %v245_v22 = vmul.f32 %v804_v21, %v1006_v36  ;;  %v261_v25 = vmul.f32 %v705_v11, %v246_v20 }
 0x1b4   :  { %v806_v23 = vpop.eup %805 }
 0x1b5   :  { %v260_v24 = vmul.f32 %v705_v11, %v245_v22  ;;  %v247_v26 = vmul.f32 %v806_v23, %v199_v42  ;;  %v294_v42 = vld [vmem:[%s1061_s2] sm:$0xf]  ;;  %s900_s2 = smov [#allocation8]  }
 0x1b6   :  { %v808_v28 = vpop.eup %807  ;;  %s690_s9 = sshll.u32 %s900_s2, 4  ;;  %s691_s9 = int_to_ptr.vmem [resolvable:$true] %s690_s9 }
 0x1b7   :  { %269 = vadd.xlane.f32.xlu1 %v260_v24  ;;  %271 = vadd.xlane.f32.xlu0 %v261_v25  ;;  %v248_v29 = vmul.f32 %v808_v28, %v200_v44  ;;  %v262_v33 = vmul.f32 %v705_v11, %v247_v26  ;;  %s863_s10 = scalar_lea.vmem %s691_s9, 64  ;;  %p868_p3 = scmp.lt.s32.totalorder %s691_s9, %s691_s9 }
 0x1b8   :  { %v810_v30 = vpop.eup %809  ;;  %p864_p2 = scmp.ne.s32.totalorder %s691_s9, %s863_s10  ;;  %p869_p4 = scmp.lt.s32.totalorder %s863_s10, %s863_s10 }
 0x1b9   :  { %v263_v34 = vmul.f32 %v705_v11, %v248_v29  ;;  %v249_v37 = vmul.f32 %v810_v30, %v201_v48 }
 0x1ba   :  { %v812_v39 = vpop.eup %811  ;;  %p870_p5 = por %p869_p4, %p868_p3 }
 0x1bb   :  { %273 = vadd.xlane.f32.xlu1 %v262_v33  ;;  %275 = vadd.xlane.f32.xlu0 %v263_v34  ;;  %v250_v38 = vmul.f32 %v812_v39, %v202_v51  ;;  %v264_v41 = vmul.f32 %v705_v11, %v249_v37  ;;  %v313_v51 = vadd.s32 4294967288, %v296_v50  ;;  %v773_v33 = vpack.c.bf16 %v998_v31, %v995_v27 }
 0x1bc   :  { %v814_v40 = vpop.eup %813  ;;  %v782_v27 = vpack.c.bf16 %v1014_v49, %v1012_v46  ;;  %p871_p6 = pnand %p870_p5, %p864_p2 }
 0x1bd   :  { %v265_v43 = vmul.f32 %v705_v11, %v250_v38  ;;  %v251_v36 = vmul.f32 %v814_v40, %v203_v53  ;;  %v316_v56 = vsub.s32 %v313_v51, %v984_v17  ;;  %774 = vmatpush3.bf16.msra.mxu1 %v773_v33  ;;  %v776_v40 = vpack.c.bf16 %v1003_v35, %v1000_v32 }
 0x1be   :  { %775 = vmatprep.subr.bf16.mxu1 %v895_v1 }
 0x1bf   :  { %277 = vadd.xlane.f32.xlu1 %v264_v41  ;;  %279 = vadd.xlane.f32.xlu0 %v265_v43  ;;  %v266_v45 = vmul.f32 %v705_v11, %v251_v36 }
 0x1c3   :  { %281 = vadd.xlane.f32.xlu1 %v266_v45 }
 0x1d5   :  { %298 = vperm.xlu0 %798, %v294_v42  }
 0x240   :  { %v268_v44 = vpop.xlane.xlu0 %267 }
 0x241   :  { %v286_v63 = vadd.f32 %v285_v52, %v268_v44 }
 0x243   :  { %v312_v9 = vrot.slane %v286_v63, %v311_v62 }
 0x244   :  { %v270_v47 = vpop.xlane.xlu1 %269  ;;  %v272_v48 = vpop.xlane.xlu0 %271 }
 0x245   :  { %v287_v57 = vadd.f32 %v285_v52, %v270_v47  ;;  %v288_v58 = vadd.f32 %v285_v52, %v272_v48 }
 0x247   :  { %v317_v4 = vrot.slane %v287_v57, %v316_v56  ;;  %v323_v5 = vrot.slane %v288_v58, %v311_v62 }
 0x248   :  { %v274_v54 = vpop.xlane.xlu1 %273  ;;  %v276_v55 = vpop.xlane.xlu0 %275 }
 0x249   :  { %v289_v53 = vadd.f32 %v285_v52, %v274_v54  ;;  %v290_v59 = vadd.f32 %v285_v52, %v276_v55  ;;  %v319_v17 = vsel %vm318_vm2, %v317_v4, %v312_v9 }
 0x24b   :  { %v327_v0 = vrot.slane %v289_v53, %v316_v56  ;;  %v332_v7 = vrot.slane %v290_v59, %v311_v62 }
 0x24c   :  { %v278_v60 = vpop.xlane.xlu1 %277  ;;  %v280_v61 = vpop.xlane.xlu0 %279 }
 0x24d   :  { %v291_v3 = vadd.f32 %v285_v52, %v278_v60  ;;  %v292_v6 = vadd.f32 %v285_v52, %v280_v61  ;;  %v328_v10 = vsel %vm318_vm2, %v327_v0, %v323_v5 }
 0x24e   :  { %v348_v18 = vsel %vm347_vm3, %v328_v10, %v319_v17 }
 0x24f   :  { %v336_v15 = vrot.slane %v291_v3, %v316_v56  ;;  %v341_v13 = vrot.slane %v292_v6, %v311_v62 }
 0x250   :  { %v282_v8 = vpop.xlane.xlu1 %281 }
 0x251   :  { %v293_v11 = vadd.f32 %v285_v52, %v282_v8  ;;  %v337_v12 = vsel %vm318_vm2, %v336_v15, %v332_v7 }
 0x252   :  { %v350_v21 = vsel %vm349_vm4, %v337_v12, %v348_v18 }
 0x253   :  { %v345_v14 = vrot.slane %v293_v11, %v316_v56 }
 0x254   :  { %v299_v16 = vpop.permute.xlu0 %298 }
 0x255   :  { %vm300_vm6 = vcmp.ge.s32.totalorder %v296_v50, %v299_v16  ;;  %v346_v20 = vsel %vm318_vm2, %v345_v14, %v341_v13 }
 0x256   :  { %v352_v22 = vsel %vm351_vm5, %v346_v20, %v350_v21 }
 0x257   :  { %v354_v23 = vsel %vm300_vm6, -1e+30, %v352_v22 }
 0x258   :  { %v356_v24 = vsel %vm355_vm7, %v354_v23, -inf }
 0x259   :  { %357 = vmax.xlane.f32.xlu1 %v356_v24 }
 0x2e6   :  { %v358_v25 = vpop.xlane.xlu1 %357 }
 0x2e7   :  { %v359_v26 = vsub.f32 %v354_v23, %v358_v25 }
 0x2e9   :  { %v360_v28 = vmul.f32 1.442695, %v359_v26 }
 0x2eb   :  { %815 = vpow2.f32 %v360_v28 }
 0x2f5   :  { %v816_v29 = vpop.eup %815 }
 0x2f6   :  { %v362_v30 = vsel %vm355_vm7, %v816_v29, 0.0 }
 0x2f7   :  { %363 = vadd.xlane.f32.xlu1 %v362_v30 }
 0x384   :  { %v364_v34 = vpop.xlane.xlu1 %363 }
 0x385   :  { %817 = vrcp.f32 %v364_v34 }
 0x38f   :  { %v818_v37 = vpop.eup %817 }
 0x390   :  { %v366_v39 = vmul.f32 %v818_v37, %v816_v29 }
 0x392   :  { %v374_v38 = vrot.slane %v366_v39, %v990_v19 }
 0x394   :  { %v375_v41 = vcombine.high %v374_v38, %v374_v38  ;;  %v382_v43 = vrot.slane %v374_v38, %v990_v19 }
 0x396   :  { %v390_v36 = vcombine.high %v382_v43, %v382_v43  ;;  %743 = vmatmul.mubr.msk.f32.vlgmr.msra.gmra.mrb[0].mxu1 %vm392_vm8, %v382_v43  ;;  %v389_v31 = vrot.slane %v375_v41, %v990_v19 }
 0x397   :  { %777 = vmatpush3.bf16.msra.mxu1 %v776_v40  ;;  %749 = vmatprep.mubr.msk.f32.mxu1 %vm896_vm0, %v897_v2 }
 0x398   :  { %757 = vmatmul.mubr.msk.f32.vlgmr.msra.gmra.mrb[2].mxu0 %vm392_vm8, %v390_v36  ;;  %781 = vmatprep.subr.bf16.mxu1 %v895_v1  ;;  %v391_v32 = vcombine.high %v389_v31, %v389_v31 }
 0x39a   :  { %750 = vmatmul.mubr.msk.f32.vlgmr.msra.gmra.mrb[2].mxu1 %vm392_vm8, %v389_v31 }
 0x39b   :  { %783 = vmatpush3.bf16.msra.mxu1 %v782_v27  ;;  %763 = vmatprep.mubr.msk.f32.mxu1 %vm896_vm0, %v897_v2 }
 0x39e   :  { %764 = vmatmul.mubr.msk.f32.vlgmr.msra.gmra.mrb[4].mxu1 %vm392_vm8, %v391_v32 }
 0x469   :  { %v461_v35 = vpop.f32.mrb[0].mxu1 }
 0x46a   :  { %681 = vst [vmem:[#allocation8] sm:$0x1] %v461_v35  ;;  %v744_v45 = vpop.f32.mrb[1].mxu1 }
 0x46b   :  { %v605_v46 = vpop.f32.mrb[2].mxu0 }
 0x46c   :  { %683 = vst [vmem:[#allocation8 + $0x2] sm:$0x1] %v605_v46  ;;  %v758_v49 = vpop.f32.mrb[3].mxu0 }
 0x46d   :  { %v533_v42 = vpop.f32.mrb[2].mxu1 }
 0x46e   :  { %682 = vst [vmem:[#allocation8 + $0x1] sm:$0x1] %v533_v42  ;;  %v751_v1 = vpop.f32.mrb[3].mxu1 }
 0x471   :  { %v677_v19 = vpop.f32.mrb[4].mxu1 }
 0x472   :  { %684 = vst [vmem:[#allocation8 + $0x3] sm:$0x1] %v677_v19  ;;  %v765_v44 = vpop.f32.mrb[5].mxu1 }
 0x473   :  { %874 = shalt.err (!%p871_p6)
}
 0x474   :  { %s875_s12 = scalar_lea.hbm %s1066_s7, 64 }
 0x475   :  { %p876_p7 = scmp.ne.s32.totalorder %s1066_s7, %s875_s12  ;;  %p879_p8 = scmp.lt.u32.totalorder %s875_s12, %s1066_s7 }
 0x477   :  { %p881_p9 = pnand %p879_p8, %p876_p7 }
 0x479   :  { %884 = shalt.err (!%p881_p9)
}
 0x47a   :  { %s901_s17 = smov 16   ;;  %s902_s18 = smov 1  }
 0x47b   :  { %696 = dma.vmem_to_hbm [thread:$0]  %s691_s9, 64, %s1066_s7, [#allocation5], %s901_s17, %s901_s17, %s902_s18  }
 0x47c   :  { %889 = dma.done.wait [#allocation5], 64  }
 0x47d   :  { %890 = vsyncadd [#allocation5], 4294967232 }
 0x47e   :  { %700 = vsyncpa [#allocation4], 1 }
 0x47f   :  { %701 = vsyncpa [#allocation7], 1 }
 0x480   :  { %702 = vsyncpa [#allocation5], 1 }

</bundles_post_ra>
